<compile_context>
chip_gen: v5e
topology: v5e:2x2
jax: 0.10.0
libtpu: 0.0.40
codegen_flags: <defaults>
</compile_context>

<pallas_src>
from functools import partial

import numpy as np
import jax
import jax.numpy as jnp
from jax import lax
from jax.experimental import pallas as pl
from jax.experimental.pallas import tpu as pltpu

EPS = 1e-4


# ----------------------------------------------------------------------------
# Pallas kernel: whole forward pass of cell_Performer_attn.pred
# ----------------------------------------------------------------------------
def performer_attn_kernel(x_rc_ref, x_cb_ref, w_qk_ref, b_qk_ref,
                          wv_blk_ref, bv_rep_ref, p_blk_ref, s_blk_ref,
                          bd_ones_ref, ctx_mask_ref,
                          out_ref, attn_ref, *, R, C, H, Dh, M):
    E = H * Dh
    HM = H * M
    RC = R * C
    ratio = float(M) ** (-0.5)

    x_rc = x_rc_ref[...]            # (R*C, E)   row-major samples
    x_cb = x_cb_ref[...]            # (C, R*E)   column-major samples (for V)

    # --- fused Q|K projection: one lane-dense matmul -------------------------
    qk = jnp.dot(x_rc, w_qk_ref[...],
                 preferred_element_type=jnp.float32) + b_qk_ref[...]   # (RC, 2E)
    q = qk[:, :E]                                                      # (RC, E)
    k = qk[:, E:]                                                      # (RC, E)

    # --- V projection directly in (C, R*E) layout ----------------------------
    v_cb = jnp.dot(x_cb, wv_blk_ref[...],
                   preferred_element_type=jnp.float32) + bv_rep_ref[...]  # (C, R*E)

    # --- random-feature logits for all heads at once (output width H*M) ------
    p_blk = p_blk_ref[...]          # (E, HM)  blockdiag(norm * proj.T)
    s_blk = s_blk_ref[...]          # (E, HM)  blockdiag(0.5 * norm^2)
    dd_q = jnp.dot(q, p_blk, preferred_element_type=jnp.float32)       # (RC, HM)
    dd_k = jnp.dot(k, p_blk, preferred_element_type=jnp.float32)
    diag_q = jnp.dot(q * q, s_blk, preferred_element_type=jnp.float32)  # (RC, HM)
    diag_k = jnp.dot(k * k, s_blk, preferred_element_type=jnp.float32)

    # --- per-head stabilizing maxes (segmented over 128-lane head blocks) ----
    def seg_lane_max(a):
        parts = []
        for h in range(H):                                   # static, H small
            m = jnp.max(a[:, h * M:(h + 1) * M], axis=-1, keepdims=True)
            parts.append(jnp.broadcast_to(m, (RC, M)))
        return jnp.concatenate(parts, axis=-1)               # (RC, HM)

    mx_q = seg_lane_max(dd_q)                                # per (row, head)
    mx_k = seg_lane_max(dd_k)
    # keys also take the max over the C columns within each row-sample r
    mx_k = jnp.max(mx_k.reshape(R, C, HM), axis=1, keepdims=True)
    mx_k = jnp.broadcast_to(mx_k, (R, C, HM)).reshape(RC, HM)

    # --- softmax-kernel features: two full-width exps -------------------------
    phi_q = ratio * (jnp.exp(dd_q - diag_q - mx_q) + EPS)    # (RC, HM)
    phi_k = ratio * (jnp.exp(dd_k - diag_k - mx_k) + EPS)

    # --- mean over the R row samples ------------------------------------------
    q_mean = jnp.mean(phi_q.reshape(R, C, HM), axis=0)       # (C, HM)
    k_mean = jnp.mean(phi_k.reshape(R, C, HM), axis=0)

    # --- linear attention for all heads / all R at once ------------------------
    k_sum = jnp.sum(k_mean, axis=0, keepdims=True)                        # (1, HM)
    denom = jnp.dot(q_mean * k_sum, bd_ones_ref[...],
                    preferred_element_type=jnp.float32)                   # (C, HM)
    qs = q_mean * pl.reciprocal(denom, approx=True)          # fold D_inv into q

    ctx = lax.dot_general(k_mean, v_cb, (((0,), (0,)), ((), ())),
                          preferred_element_type=jnp.float32)             # (HM, R*E)
    ctx = ctx * ctx_mask_ref[...]                            # kill cross-head terms
    out_ref[...] = jnp.dot(qs, ctx, preferred_element_type=jnp.float32)   # (C, R*E)

    # --- explicit attention map attn[h, q, k] ----------------------------------
    attn_parts = []
    for h in range(H):                                       # static, tiny matmuls
        qh = q_mean[:, h * M:(h + 1) * M]
        kh = k_mean[:, h * M:(h + 1) * M]
        attn_parts.append(lax.dot_general(qh, kh, (((1,), (1,)), ((), ())),
                                          preferred_element_type=jnp.float32))
    attn_ref[...] = jnp.concatenate(attn_parts, axis=-1)     # (C, H*C), single store


# ----------------------------------------------------------------------------
# Wrapper: builds lane-dense fused / block-diagonal operands, calls the kernel
# ----------------------------------------------------------------------------
def cell_performer_attn(x, params, num_heads):
    R, C, E = x.shape
    H = num_heads
    Dh = E // H
    proj = params["proj"]                       # (M, Dh)
    M = proj.shape[0]
    norm = float(Dh) ** (-0.25)
    f32 = jnp.float32

    x_rc = x.reshape(R * C, E)                                   # (R*C, E)
    x_cb = jnp.transpose(x, (1, 0, 2)).reshape(C, R * E)         # (C, R*E)

    # fused Q|K weights / biases
    w_qk = jnp.concatenate([params["wq"], params["wk"]], axis=1)  # (E, 2E)
    b_qk = jnp.concatenate([params["bq"], params["bk"]], axis=1)  # (1, 2E)

    eye_r = jnp.eye(R, dtype=f32)
    eye_h = jnp.eye(H, dtype=f32)

    # V weights replicated block-diagonally over the R row samples
    wv_blk = jnp.kron(eye_r, params["wv"])                        # (R*E, R*E)
    bv_rep = jnp.tile(params["bv"], (1, R))                       # (1, R*E)

    # block-diagonal random-feature projection (data_normalizer folded in)
    p_blk = jnp.kron(eye_h, (norm * proj).T)                      # (E, H*M)
    # diag-term broadcast matrix: sum_d q_d^2 * 0.5*norm^2, replicated over M lanes
    s_blk = jnp.kron(eye_h, jnp.full((Dh, M), 0.5 * norm * norm, f32))   # (E, H*M)
    # block-diagonal ones: per-head denominator broadcast
    bd_ones = jnp.kron(eye_h, jnp.ones((M, M), f32))              # (H*M, H*M)
    # context mask: keep only matching-head blocks of k_mean^T @ v
    ctx_mask = jnp.tile(jnp.kron(eye_h, jnp.ones((M, Dh), f32)), (1, R))  # (H*M, R*E)

    kern = partial(performer_attn_kernel, R=R, C=C, H=H, Dh=Dh, M=M)
    vmem = pl.BlockSpec(memory_space=pltpu.MemorySpace.VMEM)

    out_cb, attn_cat = pl.pallas_call(
        kern,
        out_shape=(jax.ShapeDtypeStruct((C, R * E), f32),
                   jax.ShapeDtypeStruct((C, H * C), f32)),
        in_specs=[vmem] * 10,
        out_specs=(vmem, vmem),
    )(x_rc, x_cb, w_qk, b_qk, wv_blk, bv_rep, p_blk, s_blk, bd_ones, ctx_mask)

    # layout plumbing back to the module's output shapes (cheap XLA reshapes)
    out = jnp.transpose(out_cb.reshape(C, R, E), (1, 0, 2))       # (R, C, E)
    attn = jnp.transpose(attn_cat.reshape(C, H, C), (1, 0, 2))    # (H, C, C)
    return out, attn


# ----------------------------------------------------------------------------
# Deterministic parameter construction (mirrors the PyTorch __init__ shapes)
# ----------------------------------------------------------------------------
def gaussian_orthogonal_random_matrix(key, nb_rows, nb_columns):
    nb_full_blocks = nb_rows // nb_columns
    keys = jax.random.split(key, nb_full_blocks + 2)
    blocks = []
    for i in range(nb_full_blocks):
        unstructured = jax.random.normal(keys[i], (nb_columns, nb_columns), jnp.float32)
        q, _ = jnp.linalg.qr(unstructured)
        blocks.append(q.T)
    remaining = nb_rows - nb_full_blocks * nb_columns
    if remaining > 0:
        unstructured = jax.random.normal(keys[nb_full_blocks],
                                         (nb_columns, nb_columns), jnp.float32)
        q, _ = jnp.linalg.qr(unstructured)
        blocks.append(q.T[:remaining])
    final = jnp.concatenate(blocks, axis=0)                       # (nb_rows, nb_cols)
    multiplier = jnp.linalg.norm(
        jax.random.normal(keys[-1], (nb_rows, nb_columns), jnp.float32), axis=1)
    return multiplier[:, None] * final


# ----------------------------------------------------------------------------
# Pure-JAX reference (mirrors the PyTorch forward exactly) for validation
# ----------------------------------------------------------------------------
def reference(x, params, num_heads):
    R, C, E = x.shape
    Dh = E // num_heads
    proj = params["proj"]
    M = proj.shape[0]

    def lin(w, b):
        return x @ w + b                                           # (R, C, E)

    q = lin(params["wq"], params["bq"]).reshape(R, C, num_heads, Dh).transpose(0, 2, 1, 3)
    k = lin(params["wk"], params["bk"]).reshape(R, C, num_heads, Dh).transpose(0, 2, 1, 3)
    v = lin(params["wv"], params["bv"]).reshape(R, C, num_heads, Dh).transpose(0, 2, 1, 3)

    def feat(data, is_query):
        norm = Dh ** (-0.25)
        ratio = M ** (-0.5)
        dd = jnp.einsum("rhcd,md->rhcm", norm * data, proj)
        diag = (data ** 2).sum(-1) / 2.0 * norm ** 2
        diag = diag[..., None]
        if is_query:
            mx = jnp.max(dd, axis=-1, keepdims=True)
        else:
            mx = jnp.max(dd, axis=(-1, -2), keepdims=True)
        return ratio * (jnp.exp(dd - diag - mx) + EPS)

    qf = feat(q, True).mean(0)                                     # (H, C, M)
    kf = feat(k, False).mean(0)
    vv = v.transpose(1, 2, 0, 3).reshape(num_heads, C, R * Dh)     # (H, C, R*Dh)

    k_cumsum = kf.sum(-2)
    d_inv = 1.0 / jnp.einsum("hnd,hd->hn", qf, k_cumsum)
    context = jnp.einsum("hnd,hne->hde", kf, vv)
    out = jnp.einsum("hde,hnd,hn->hne", context, qf, d_inv)        # (H, C, R*Dh)
    out = out.reshape(num_heads, C, R, Dh).transpose(2, 1, 0, 3).reshape(R, C, E)
    attn = jnp.einsum("hqf,hkf->hqk", qf, kf)
    return out, attn


# ----------------------------------------------------------------------------
if __name__ == "__main__":
    # small, deterministic config (num_rows, num_cols, embed_dim, num_heads)
    R, C, E, H = 2, 8, 32, 4
    Dh = E // H
    M = E                        # nb_features = embed_dim

    key = jax.random.PRNGKey(0)
    k_x, k_wq, k_wk, k_wv, k_bq, k_bk, k_bv, k_proj = jax.random.split(key, 8)

    x = jax.random.normal(k_x, (R, C, E), jnp.float32)
    params = {
        "wq": 0.1 * jax.random.normal(k_wq, (E, E), jnp.float32),
        "wk": 0.1 * jax.random.normal(k_wk, (E, E), jnp.float32),
        "wv": 0.1 * jax.random.normal(k_wv, (E, E), jnp.float32),
        "bq": 0.1 * jax.random.normal(k_bq, (1, E), jnp.float32),
        "bk": 0.1 * jax.random.normal(k_bk, (1, E), jnp.float32),
        "bv": 0.1 * jax.random.normal(k_bv, (1, E), jnp.float32),
        "proj": gaussian_orthogonal_random_matrix(k_proj, M, Dh),
    }

    fn = jax.jit(partial(cell_performer_attn, num_heads=H))
    out, attn = fn(x, params)
    out, attn = jax.block_until_ready((out, attn))

    out_ref, attn_ref = reference(x, params, H)
    assert out.shape == (R, C, E) and attn.shape == (H, C, C)
    # out uses the EUP approximate reciprocal -> slightly looser tolerance
    np.testing.assert_allclose(np.asarray(out), np.asarray(out_ref), rtol=3e-3, atol=1e-4)
    np.testing.assert_allclose(np.asarray(attn), np.asarray(attn_ref), rtol=1e-4, atol=1e-5)

    print("KERNEL_OK")
</pallas_src>

<mosaic_0001>
module attributes {stable_mosaic.version = 11 : i64} {
  func.func @performer_attn_kernel(%arg0: memref<16x32xf32, #tpu.memory_space<vmem>>, %arg1: memref<8x64xf32, #tpu.memory_space<vmem>>, %arg2: memref<32x64xf32, #tpu.memory_space<vmem>>, %arg3: memref<1x64xf32, #tpu.memory_space<vmem>>, %arg4: memref<64x64xf32, #tpu.memory_space<vmem>>, %arg5: memref<1x64xf32, #tpu.memory_space<vmem>>, %arg6: memref<32x128xf32, #tpu.memory_space<vmem>>, %arg7: memref<32x128xf32, #tpu.memory_space<vmem>>, %arg8: memref<128x128xf32, #tpu.memory_space<vmem>>, %arg9: memref<128x64xf32, #tpu.memory_space<vmem>>, %arg10: memref<8x64xf32, #tpu.memory_space<vmem>>, %arg11: memref<8x32xf32, #tpu.memory_space<vmem>>) attributes {dimension_semantics = [], scalar_prefetch = 0 : i64, scratch_operands = 0 : i64, tpu.core_type = #tpu.core_type<tc>} {
    %c0 = arith.constant 0 : index
    %c0_0 = arith.constant 0 : index
    %0 = vector.load %arg0[%c0, %c0_0] : memref<16x32xf32, #tpu.memory_space<vmem>>, vector<16x32xf32>
    %c0_1 = arith.constant 0 : index
    %c0_2 = arith.constant 0 : index
    %1 = vector.load %arg1[%c0_1, %c0_2] : memref<8x64xf32, #tpu.memory_space<vmem>>, vector<8x64xf32>
    %c0_3 = arith.constant 0 : index
    %c0_4 = arith.constant 0 : index
    %2 = vector.load %arg2[%c0_3, %c0_4] : memref<32x64xf32, #tpu.memory_space<vmem>>, vector<32x64xf32>
    %cst = arith.constant dense<0.000000e+00> : vector<16x64xf32>
    %3 = tpu.matmul %0, %2, %cst {dimension_numbers = #tpu.dot_dimension_numbers<[1], [0], [0], [1], [0, 0, 1, 1], [], []>} : vector<16x32xf32>, vector<32x64xf32>, vector<16x64xf32> -> vector<16x64xf32>
    %c0_5 = arith.constant 0 : index
    %c0_6 = arith.constant 0 : index
    %4 = vector.load %arg3[%c0_5, %c0_6] : memref<1x64xf32, #tpu.memory_space<vmem>>, vector<1x64xf32>
    %5 = vector.broadcast %4 : vector<1x64xf32> to vector<16x64xf32>
    %6 = arith.addf %3, %5 : vector<16x64xf32>
    %7 = vector.extract_strided_slice %6 {offsets = [0, 0], sizes = [16, 32], strides = [1, 1]} : vector<16x64xf32> to vector<16x32xf32>
    %8 = vector.extract_strided_slice %6 {offsets = [0, 32], sizes = [16, 32], strides = [1, 1]} : vector<16x64xf32> to vector<16x32xf32>
    %c0_7 = arith.constant 0 : index
    %c0_8 = arith.constant 0 : index
    %9 = vector.load %arg4[%c0_7, %c0_8] : memref<64x64xf32, #tpu.memory_space<vmem>>, vector<64x64xf32>
    %cst_9 = arith.constant dense<0.000000e+00> : vector<8x64xf32>
    %10 = tpu.matmul %1, %9, %cst_9 {dimension_numbers = #tpu.dot_dimension_numbers<[1], [0], [0], [1], [0, 0, 1, 1], [], []>} : vector<8x64xf32>, vector<64x64xf32>, vector<8x64xf32> -> vector<8x64xf32>
    %c0_10 = arith.constant 0 : index
    %c0_11 = arith.constant 0 : index
    %11 = vector.load %arg5[%c0_10, %c0_11] : memref<1x64xf32, #tpu.memory_space<vmem>>, vector<1x64xf32>
    %12 = vector.broadcast %11 : vector<1x64xf32> to vector<8x64xf32>
    %13 = arith.addf %10, %12 : vector<8x64xf32>
    %c0_12 = arith.constant 0 : index
    %c0_13 = arith.constant 0 : index
    %14 = vector.load %arg6[%c0_12, %c0_13] : memref<32x128xf32, #tpu.memory_space<vmem>>, vector<32x128xf32>
    %c0_14 = arith.constant 0 : index
    %c0_15 = arith.constant 0 : index
    %15 = vector.load %arg7[%c0_14, %c0_15] : memref<32x128xf32, #tpu.memory_space<vmem>>, vector<32x128xf32>
    %cst_16 = arith.constant dense<0.000000e+00> : vector<16x128xf32>
    %16 = tpu.matmul %7, %14, %cst_16 {dimension_numbers = #tpu.dot_dimension_numbers<[1], [0], [0], [1], [0, 0, 1, 1], [], []>} : vector<16x32xf32>, vector<32x128xf32>, vector<16x128xf32> -> vector<16x128xf32>
    %cst_17 = arith.constant dense<0.000000e+00> : vector<16x128xf32>
    %17 = tpu.matmul %8, %14, %cst_17 {dimension_numbers = #tpu.dot_dimension_numbers<[1], [0], [0], [1], [0, 0, 1, 1], [], []>} : vector<16x32xf32>, vector<32x128xf32>, vector<16x128xf32> -> vector<16x128xf32>
    %18 = arith.mulf %7, %7 : vector<16x32xf32>
    %cst_18 = arith.constant dense<0.000000e+00> : vector<16x128xf32>
    %19 = tpu.matmul %18, %15, %cst_18 {dimension_numbers = #tpu.dot_dimension_numbers<[1], [0], [0], [1], [0, 0, 1, 1], [], []>} : vector<16x32xf32>, vector<32x128xf32>, vector<16x128xf32> -> vector<16x128xf32>
    %20 = arith.mulf %8, %8 : vector<16x32xf32>
    %cst_19 = arith.constant dense<0.000000e+00> : vector<16x128xf32>
    %21 = tpu.matmul %20, %15, %cst_19 {dimension_numbers = #tpu.dot_dimension_numbers<[1], [0], [0], [1], [0, 0, 1, 1], [], []>} : vector<16x32xf32>, vector<32x128xf32>, vector<16x128xf32> -> vector<16x128xf32>
    %22 = vector.extract_strided_slice %16 {offsets = [0, 0], sizes = [16, 32], strides = [1, 1]} : vector<16x128xf32> to vector<16x32xf32>
    %cst_20 = arith.constant dense<0xFF800000> : vector<16xf32>
    %23 = vector.multi_reduction <maximumf>, %22, %cst_20 [1] : vector<16x32xf32> to vector<16xf32>
    %24 = vector.shape_cast %23 : vector<16xf32> to vector<16x1xf32>
    %25 = vector.shape_cast %24 : vector<16x1xf32> to vector<16x1xf32>
    %26 = vector.broadcast %25 : vector<16x1xf32> to vector<16x32xf32>
    %27 = vector.extract_strided_slice %16 {offsets = [0, 32], sizes = [16, 32], strides = [1, 1]} : vector<16x128xf32> to vector<16x32xf32>
    %cst_21 = arith.constant dense<0xFF800000> : vector<16xf32>
    %28 = vector.multi_reduction <maximumf>, %27, %cst_21 [1] : vector<16x32xf32> to vector<16xf32>
    %29 = vector.shape_cast %28 : vector<16xf32> to vector<16x1xf32>
    %30 = vector.shape_cast %29 : vector<16x1xf32> to vector<16x1xf32>
    %31 = vector.broadcast %30 : vector<16x1xf32> to vector<16x32xf32>
    %32 = vector.extract_strided_slice %16 {offsets = [0, 64], sizes = [16, 32], strides = [1, 1]} : vector<16x128xf32> to vector<16x32xf32>
    %cst_22 = arith.constant dense<0xFF800000> : vector<16xf32>
    %33 = vector.multi_reduction <maximumf>, %32, %cst_22 [1] : vector<16x32xf32> to vector<16xf32>
    %34 = vector.shape_cast %33 : vector<16xf32> to vector<16x1xf32>
    %35 = vector.shape_cast %34 : vector<16x1xf32> to vector<16x1xf32>
    %36 = vector.broadcast %35 : vector<16x1xf32> to vector<16x32xf32>
    %37 = vector.extract_strided_slice %16 {offsets = [0, 96], sizes = [16, 32], strides = [1, 1]} : vector<16x128xf32> to vector<16x32xf32>
    %cst_23 = arith.constant dense<0xFF800000> : vector<16xf32>
    %38 = vector.multi_reduction <maximumf>, %37, %cst_23 [1] : vector<16x32xf32> to vector<16xf32>
    %39 = vector.shape_cast %38 : vector<16xf32> to vector<16x1xf32>
    %40 = vector.shape_cast %39 : vector<16x1xf32> to vector<16x1xf32>
    %41 = vector.broadcast %40 : vector<16x1xf32> to vector<16x32xf32>
    %42 = tpu.concatenate %26, %31, %36, %41 in 1 : vector<16x32xf32>, vector<16x32xf32>, vector<16x32xf32>, vector<16x32xf32> -> vector<16x128xf32>
    %43 = vector.extract_strided_slice %17 {offsets = [0, 0], sizes = [16, 32], strides = [1, 1]} : vector<16x128xf32> to vector<16x32xf32>
    %cst_24 = arith.constant dense<0xFF800000> : vector<16xf32>
    %44 = vector.multi_reduction <maximumf>, %43, %cst_24 [1] : vector<16x32xf32> to vector<16xf32>
    %45 = vector.shape_cast %44 : vector<16xf32> to vector<16x1xf32>
    %46 = vector.shape_cast %45 : vector<16x1xf32> to vector<16x1xf32>
    %47 = vector.broadcast %46 : vector<16x1xf32> to vector<16x32xf32>
    %48 = vector.extract_strided_slice %17 {offsets = [0, 32], sizes = [16, 32], strides = [1, 1]} : vector<16x128xf32> to vector<16x32xf32>
    %cst_25 = arith.constant dense<0xFF800000> : vector<16xf32>
    %49 = vector.multi_reduction <maximumf>, %48, %cst_25 [1] : vector<16x32xf32> to vector<16xf32>
    %50 = vector.shape_cast %49 : vector<16xf32> to vector<16x1xf32>
    %51 = vector.shape_cast %50 : vector<16x1xf32> to vector<16x1xf32>
    %52 = vector.broadcast %51 : vector<16x1xf32> to vector<16x32xf32>
    %53 = vector.extract_strided_slice %17 {offsets = [0, 64], sizes = [16, 32], strides = [1, 1]} : vector<16x128xf32> to vector<16x32xf32>
    %cst_26 = arith.constant dense<0xFF800000> : vector<16xf32>
    %54 = vector.multi_reduction <maximumf>, %53, %cst_26 [1] : vector<16x32xf32> to vector<16xf32>
    %55 = vector.shape_cast %54 : vector<16xf32> to vector<16x1xf32>
    %56 = vector.shape_cast %55 : vector<16x1xf32> to vector<16x1xf32>
    %57 = vector.broadcast %56 : vector<16x1xf32> to vector<16x32xf32>
    %58 = vector.extract_strided_slice %17 {offsets = [0, 96], sizes = [16, 32], strides = [1, 1]} : vector<16x128xf32> to vector<16x32xf32>
    %cst_27 = arith.constant dense<0xFF800000> : vector<16xf32>
    %59 = vector.multi_reduction <maximumf>, %58, %cst_27 [1] : vector<16x32xf32> to vector<16xf32>
    %60 = vector.shape_cast %59 : vector<16xf32> to vector<16x1xf32>
    %61 = vector.shape_cast %60 : vector<16x1xf32> to vector<16x1xf32>
    %62 = vector.broadcast %61 : vector<16x1xf32> to vector<16x32xf32>
    %63 = tpu.concatenate %47, %52, %57, %62 in 1 : vector<16x32xf32>, vector<16x32xf32>, vector<16x32xf32>, vector<16x32xf32> -> vector<16x128xf32>
    %64 = vector.shape_cast %63 : vector<16x128xf32> to vector<2x8x128xf32>
    %cst_28 = arith.constant dense<0xFF800000> : vector<2x128xf32>
    %65 = vector.multi_reduction <maximumf>, %64, %cst_28 [1] : vector<2x8x128xf32> to vector<2x128xf32>
    %66 = vector.shape_cast %65 : vector<2x128xf32> to vector<2x1x128xf32>
    %67 = vector.shape_cast %66 : vector<2x1x128xf32> to vector<2x1x128xf32>
    %68 = vector.broadcast %67 : vector<2x1x128xf32> to vector<2x8x128xf32>
    %69 = vector.shape_cast %68 : vector<2x8x128xf32> to vector<16x128xf32>
    %70 = arith.subf %16, %19 : vector<16x128xf32>
    %71 = arith.subf %70, %42 : vector<16x128xf32>
    %72 = math.exp %71 : vector<16x128xf32>
    %cst_29 = arith.constant 9.99999974E-5 : f32
    %73 = vector.broadcast %cst_29 : f32 to vector<16x128xf32>
    %74 = arith.addf %72, %73 : vector<16x128xf32>
    %cst_30 = arith.constant 0.176776692 : f32
    %75 = vector.broadcast %cst_30 : f32 to vector<16x128xf32>
    %76 = arith.mulf %75, %74 : vector<16x128xf32>
    %77 = arith.subf %17, %21 : vector<16x128xf32>
    %78 = arith.subf %77, %69 : vector<16x128xf32>
    %79 = math.exp %78 : vector<16x128xf32>
    %cst_31 = arith.constant 9.99999974E-5 : f32
    %80 = vector.broadcast %cst_31 : f32 to vector<16x128xf32>
    %81 = arith.addf %79, %80 : vector<16x128xf32>
    %cst_32 = arith.constant 0.176776692 : f32
    %82 = vector.broadcast %cst_32 : f32 to vector<16x128xf32>
    %83 = arith.mulf %82, %81 : vector<16x128xf32>
    %84 = vector.shape_cast %76 : vector<16x128xf32> to vector<2x8x128xf32>
    %cst_33 = arith.constant dense<0.000000e+00> : vector<8x128xf32>
    %85 = vector.multi_reduction <add>, %84, %cst_33 [0] : vector<2x8x128xf32> to vector<8x128xf32>
    %cst_34 = arith.constant 2.000000e+00 : f32
    %86 = vector.broadcast %cst_34 : f32 to vector<8x128xf32>
    %87 = arith.divf %85, %86 : vector<8x128xf32>
    %88 = vector.shape_cast %83 : vector<16x128xf32> to vector<2x8x128xf32>
    %cst_35 = arith.constant dense<0.000000e+00> : vector<8x128xf32>
    %89 = vector.multi_reduction <add>, %88, %cst_35 [0] : vector<2x8x128xf32> to vector<8x128xf32>
    %cst_36 = arith.constant 2.000000e+00 : f32
    %90 = vector.broadcast %cst_36 : f32 to vector<8x128xf32>
    %91 = arith.divf %89, %90 : vector<8x128xf32>
    %cst_37 = arith.constant dense<0.000000e+00> : vector<128xf32>
    %92 = vector.multi_reduction <add>, %91, %cst_37 [0] : vector<8x128xf32> to vector<128xf32>
    %93 = vector.shape_cast %92 : vector<128xf32> to vector<1x128xf32>
    %94 = vector.broadcast %93 : vector<1x128xf32> to vector<8x128xf32>
    %95 = arith.mulf %87, %94 : vector<8x128xf32>
    %c0_38 = arith.constant 0 : index
    %c0_39 = arith.constant 0 : index
    %96 = vector.load %arg8[%c0_38, %c0_39] : memref<128x128xf32, #tpu.memory_space<vmem>>, vector<128x128xf32>
    %cst_40 = arith.constant dense<0.000000e+00> : vector<8x128xf32>
    %97 = tpu.matmul %95, %96, %cst_40 {dimension_numbers = #tpu.dot_dimension_numbers<[1], [0], [0], [1], [0, 0, 1, 1], [], []>} : vector<8x128xf32>, vector<128x128xf32>, vector<8x128xf32> -> vector<8x128xf32>
    %98 = tpu.reciprocal %97 {approx = true} : vector<8x128xf32> -> vector<8x128xf32>
    %99 = arith.mulf %87, %98 : vector<8x128xf32>
    %cst_41 = arith.constant dense<0.000000e+00> : vector<128x64xf32>
    %100 = tpu.matmul %91, %13, %cst_41 {dimension_numbers = #tpu.dot_dimension_numbers<[0], [0], [1], [1], [0, 1, 1, 1], [], []>} : vector<8x128xf32>, vector<8x64xf32>, vector<128x64xf32> -> vector<128x64xf32>
    %c0_42 = arith.constant 0 : index
    %c0_43 = arith.constant 0 : index
    %101 = vector.load %arg9[%c0_42, %c0_43] : memref<128x64xf32, #tpu.memory_space<vmem>>, vector<128x64xf32>
    %102 = arith.mulf %100, %101 : vector<128x64xf32>
    %cst_44 = arith.constant dense<0.000000e+00> : vector<8x64xf32>
    %103 = tpu.matmul %99, %102, %cst_44 {dimension_numbers = #tpu.dot_dimension_numbers<[1], [0], [0], [1], [0, 0, 1, 1], [], []>} : vector<8x128xf32>, vector<128x64xf32>, vector<8x64xf32> -> vector<8x64xf32>
    %c0_45 = arith.constant 0 : index
    %c0_46 = arith.constant 0 : index
    %104 = vector.load %arg10[%c0_45, %c0_46] : memref<8x64xf32, #tpu.memory_space<vmem>>, vector<8x64xf32>
    tpu.vector_store %arg10[%c0_45, %c0_46], %103 {strides = array<i32>} : memref<8x64xf32, #tpu.memory_space<vmem>>, vector<8x64xf32>,
    %105 = vector.extract_strided_slice %87 {offsets = [0, 0], sizes = [8, 32], strides = [1, 1]} : vector<8x128xf32> to vector<8x32xf32>
    %106 = vector.extract_strided_slice %91 {offsets = [0, 0], sizes = [8, 32], strides = [1, 1]} : vector<8x128xf32> to vector<8x32xf32>
    %cst_47 = arith.constant dense<0.000000e+00> : vector<8x8xf32>
    %107 = tpu.matmul %105, %106, %cst_47 {dimension_numbers = #tpu.dot_dimension_numbers<[1], [1], [0], [0], [0, 0, 1, 0], [], []>} : vector<8x32xf32>, vector<8x32xf32>, vector<8x8xf32> -> vector<8x8xf32>
    %108 = vector.extract_strided_slice %87 {offsets = [0, 32], sizes = [8, 32], strides = [1, 1]} : vector<8x128xf32> to vector<8x32xf32>
    %109 = vector.extract_strided_slice %91 {offsets = [0, 32], sizes = [8, 32], strides = [1, 1]} : vector<8x128xf32> to vector<8x32xf32>
    %cst_48 = arith.constant dense<0.000000e+00> : vector<8x8xf32>
    %110 = tpu.matmul %108, %109, %cst_48 {dimension_numbers = #tpu.dot_dimension_numbers<[1], [1], [0], [0], [0, 0, 1, 0], [], []>} : vector<8x32xf32>, vector<8x32xf32>, vector<8x8xf32> -> vector<8x8xf32>
    %111 = vector.extract_strided_slice %87 {offsets = [0, 64], sizes = [8, 32], strides = [1, 1]} : vector<8x128xf32> to vector<8x32xf32>
    %112 = vector.extract_strided_slice %91 {offsets = [0, 64], sizes = [8, 32], strides = [1, 1]} : vector<8x128xf32> to vector<8x32xf32>
    %cst_49 = arith.constant dense<0.000000e+00> : vector<8x8xf32>
    %113 = tpu.matmul %111, %112, %cst_49 {dimension_numbers = #tpu.dot_dimension_numbers<[1], [1], [0], [0], [0, 0, 1, 0], [], []>} : vector<8x32xf32>, vector<8x32xf32>, vector<8x8xf32> -> vector<8x8xf32>
    %114 = vector.extract_strided_slice %87 {offsets = [0, 96], sizes = [8, 32], strides = [1, 1]} : vector<8x128xf32> to vector<8x32xf32>
    %115 = vector.extract_strided_slice %91 {offsets = [0, 96], sizes = [8, 32], strides = [1, 1]} : vector<8x128xf32> to vector<8x32xf32>
    %cst_50 = arith.constant dense<0.000000e+00> : vector<8x8xf32>
    %116 = tpu.matmul %114, %115, %cst_50 {dimension_numbers = #tpu.dot_dimension_numbers<[1], [1], [0], [0], [0, 0, 1, 0], [], []>} : vector<8x32xf32>, vector<8x32xf32>, vector<8x8xf32> -> vector<8x8xf32>
    %117 = tpu.concatenate %107, %110, %113, %116 in 1 : vector<8x8xf32>, vector<8x8xf32>, vector<8x8xf32>, vector<8x8xf32> -> vector<8x32xf32>
    %c0_51 = arith.constant 0 : index
    %c0_52 = arith.constant 0 : index
    %118 = vector.load %arg11[%c0_51, %c0_52] : memref<8x32xf32, #tpu.memory_space<vmem>>, vector<8x32xf32>
    tpu.vector_store %arg11[%c0_51, %c0_52], %117 {strides = array<i32>} : memref<8x32xf32, #tpu.memory_space<vmem>>, vector<8x32xf32>,
    return
  }
}

</mosaic_0001>

<bundles_post_ra>
// kernel: cell_performer_attn.1
= control target key start
LH: loop header
LB: loop body
LE: loop exit
PB: predicated region body
PF: predicated region fallthrough
CT: control target
= control target key end

     0   :  { %vm48_vm0 = vcmask 261120   ;;  %vm90_vm1 = vcmask 523264   ;;  %vm250_vm2 = vcmask 523520   ;;  %vm257_vm3 = vcmask 785920   ;;  %s801_s25 = smov 32   ;;  %s803_s30 = smov 8   ;;  %s1147_s2 = inlined_call_operand.vmem [shape: f32[32,64], index: 2, kind: input, shape index: {}]   ;;  %s1148_s6 = inlined_call_operand.vmem [shape: f32[32,128], index: 6, kind: input, shape index: {}]   ;;  %s1149_s3 = inlined_call_operand.vmem [shape: f32[1,64], index: 3, kind: input, shape index: {}]   ;;  %s1150_s0 = inlined_call_operand.vmem [shape: f32[16,32], index: 0, kind: input, shape index: {}]   ;;  %s1151_s4 = inlined_call_operand.vmem [shape: f32[64,64], index: 4, kind: input, shape index: {}]   ;;  %s1152_s7 = inlined_call_operand.vmem [shape: f32[32,128], index: 7, kind: input, shape index: {}]   ;;  %s1153_s1 = inlined_call_operand.vmem [shape: f32[8,64], index: 1, kind: input, shape index: {}]   ;;  %s1154_s5 = inlined_call_operand.vmem [shape: f32[1,64], index: 5, kind: input, shape index: {}]   ;;  %s1155_s8 = inlined_call_operand.vmem [shape: f32[128,128], index: 8, kind: input, shape index: {}]   ;;  %s1156_s9 = inlined_call_operand.vmem [shape: f32[128,64], index: 9, kind: input, shape index: {}]   ;;  %s1157_s10 = inlined_call_operand.vmem [shape: f32[8,64], index: 10, kind: output, shape index: {0}]   ;;  %s1158_s11 = inlined_call_operand.vmem [shape: f32[8,32], index: 11, kind: output, shape index: {1}]  }
   0x1   :  { %v43_v0 = vld [vmem:[%s1147_s2 + $0x18] sm:$0xff]  ;;  %v42_v1 = vld [vmem:[%s1147_s2 + $0x10] sm:$0xff]  ;;  %v41_v2 = vld [vmem:[%s1147_s2 + $0x8] sm:$0xff]  ;;  %vm264_vm4 = vcmask 1048320   ;;  %vm275_vm5 = vcmask 785408   ;;  %vm432_vm7 = vcmask 64512  }
   0x2   :  { %67 = vmatpush.msra.mxu1 %v43_v0  ;;  %v117_v3 = vld [vmem:[%s1148_s6 + $0x18] sm:$0xff]  ;;  %v116_v4 = vld [vmem:[%s1148_s6 + $0x10] sm:$0xff]  ;;  %v40_v5 = vld [vmem:[%s1147_s2] sm:$0xff]  ;;  %s804_s12 = smov 24   ;;  %vm722_vm8 = vcmask 130048   ;;  %vm724_vm9 = vcmask 195584  }
   0x3   :  { %140 = vmatpush.msra.mxu2 %v117_v3  ;;  %770 = vmatpush.msra.mxu3 %v117_v3  ;;  %v37_v6 = vld [vmem:[%s1150_s0] sm:$0xff]  ;;  %v38_v7 = vld [vmem:[%s1150_s0 + $0x8] sm:$0xff]  ;;  %v85_v10 = vld [vmem:[%s1151_s4 + $0x38] sm:$0xff] }
   0x4   :  { %68 = vmatpush.msra.mxu1 %v42_v1  ;;  %171 = vmatpush.msra.mxu0 %v117_v3  ;;  %v115_v8 = vld [vmem:[%s1148_s6 + $0x8] sm:$0xff]  ;;  %v114_v9 = vld [vmem:[%s1148_s6] sm:$0xff]  ;;  %v84_v11 = vld [vmem:[%s1151_s4 + $0x30] sm:$0xff] }
   0x5   :  { %141 = vmatpush.msra.mxu2 %v116_v4  ;;  %771 = vmatpush.msra.mxu3 %v116_v4  ;;  %v83_v12 = vld [vmem:[%s1151_s4 + $0x28] sm:$0xff]  ;;  %v121_v13 = vld [vmem:[%s1152_s7 + $0x18] sm:$0xff]  ;;  %v82_v14 = vld [vmem:[%s1151_s4 + $0x20] sm:$0xff] }
   0x6   :  { %69 = vmatpush.msra.mxu1 %v41_v2  ;;  %172 = vmatpush.msra.mxu0 %v116_v4  ;;  %v120_v15 = vld [vmem:[%s1152_s7 + $0x10] sm:$0xff]  ;;  %v81_v16 = vld [vmem:[%s1151_s4 + $0x18] sm:$0xff]  ;;  %v119_v17 = vld [vmem:[%s1152_s7 + $0x8] sm:$0xff] }
   0x7   :  { %142 = vmatpush.msra.mxu2 %v115_v8  ;;  %772 = vmatpush.msra.mxu3 %v115_v8  ;;  %v80_v18 = vld [vmem:[%s1151_s4 + $0x10] sm:$0xff]  ;;  %v118_v19 = vld [vmem:[%s1152_s7] sm:$0xff]  ;;  %v79_v21 = vld [vmem:[%s1151_s4 + $0x8] sm:$0xff] }
   0x8   :  { %70 = vmatpush.msra.mxu1 %v40_v5  ;;  %173 = vmatpush.msra.mxu0 %v115_v8  ;;  %v784_v20 = vld [vmem:[%s1149_s3] ss:$0 sm:$0xff]  ;;  %s798_s3 = smov 96   ;;  %v377_v57 = vld [vmem:[%s1155_s8 + $0x78] sm:$0xff]  ;;  %v376_v58 = vld [vmem:[%s1155_s8 + $0x70] sm:$0xff] }
   0x9   :  { %735 = vmatmul.msk.f32.vlgmr.msra.gmra.mxu1 %vm48_vm0, %v37_v6  ;;  %143 = vmatpush.msra.mxu2 %v114_v9  ;;  %v78_v22 = vld [vmem:[%s1151_s4] sm:$0xff]  ;;  %v375_v59 = vld [vmem:[%s1155_s8 + $0x68] sm:$0xff]  ;;  %v373_v61 = vld [vmem:[%s1155_s8 + $0x58] sm:$0xff] }
   0xa   :  { %773 = vmatpush.msra.mxu3 %v114_v9  ;;  %174 = vmatpush.msra.mxu0 %v114_v9  ;;  %v39_v24 = vld [vmem:[%s1153_s1] sm:$0xff]  ;;  %v372_v62 = vld [vmem:[%s1155_s8 + $0x50] sm:$0xff]  ;;  %v371_v63 = vld [vmem:[%s1155_s8 + $0x48] sm:$0xff] }
   0xb   :  { %102 = vmatpush.msrb.mxu1 %v85_v10  ;;  %v785_v32 = vld [vmem:[%s1154_s5] ss:$0 sm:$0xff]  ;;  %378 = vmatpush.msrb.mxu2 %v377_v57  ;;  %v369_v1 = vld [vmem:[%s1155_s8 + $0x38] sm:$0xff]  ;;  %v368_v2 = vld [vmem:[%s1155_s8 + $0x30] sm:$0xff] }
   0xc   :  { %202 = vmatpush.msrb.mxu0 %v121_v13  ;;  %v374_v60 = vld [vmem:[%s1155_s8 + $0x60] sm:$0xff]  ;;  %v367_v3 = vld [vmem:[%s1155_s8 + $0x28] sm:$0xff]  ;;  %v365_v6 = vld [vmem:[%s1155_s8 + $0x18] sm:$0xff] }
   0xd   :  { %103 = vmatpush.msrb.mxu1 %v84_v11  ;;  %379 = vmatpush.msrb.mxu2 %v376_v58  ;;  %v370_v0 = vld [vmem:[%s1155_s8 + $0x40] sm:$0xff]  ;;  %v364_v9 = vld [vmem:[%s1155_s8 + $0x10] sm:$0xff]  ;;  %v363_v10 = vld [vmem:[%s1155_s8 + $0x8] sm:$0xff] }
   0xe   :  { %203 = vmatpush.msrb.mxu0 %v120_v15  ;;  %v366_v4 = vld [vmem:[%s1155_s8 + $0x20] sm:$0xff] }
   0xf   :  { %104 = vmatpush.msrb.mxu1 %v83_v12  ;;  %380 = vmatpush.msrb.mxu2 %v375_v59  ;;  %v362_v11 = vld [vmem:[%s1155_s8] sm:$0xff]  ;;  %s800_s8 = smov 64  }
  0x10   :  { %204 = vmatpush.msrb.mxu0 %v119_v17 }
  0x11   :  { %736 = vmatmul.msk.f32.gmra.mxu1 %vm48_vm0, %v38_v7  ;;  %381 = vmatpush.msrb.mxu2 %v374_v60 }
  0x12   :  { %105 = vmatpush.msrb.mxu1 %v82_v14  ;;  %205 = vmatpush.msrb.mxu0 %v118_v19 }
  0x13   :  { %382 = vmatpush.msrb.mxu2 %v373_v61 }
  0x14   :  { %106 = vmatpush.msrb.mxu1 %v81_v16 }
  0x15   :  { %383 = vmatpush.msrb.mxu2 %v372_v62 }
  0x16   :  { %107 = vmatpush.msrb.mxu1 %v80_v18 }
  0x17   :  { %384 = vmatpush.msrb.mxu2 %v371_v63 }
  0x18   :  { %108 = vmatpush.msrb.mxu1 %v79_v21  ;;  %v799_v21 = vmov 2.0  }
  0x19   :  { %385 = vmatpush.msrb.mxu2 %v370_v0  ;;  %786 = vrcp.f32 %v799_v21 }
  0x1a   :  { %109 = vmatpush.msrb.mxu1 %v78_v22 }
  0x1b   :  { %737 = vmatmul.msk.f32.vlgmr.msrb.gmra.mxu1 %vm90_vm1, %v39_v24  ;;  %386 = vmatpush.msrb.mxu2 %v369_v1 }
  0x1c   :  { %233 = vmatpush.msra.mxu1 %v121_v13 }
  0x1d   :  { %387 = vmatpush.msrb.mxu2 %v368_v2 }
  0x1e   :  { %234 = vmatpush.msra.mxu1 %v120_v15 }
  0x1f   :  { %388 = vmatpush.msrb.mxu2 %v367_v3 }
  0x20   :  { %235 = vmatpush.msra.mxu1 %v119_v17 }
  0x21   :  { %389 = vmatpush.msrb.mxu2 %v366_v4 }
  0x22   :  { %236 = vmatpush.msra.mxu1 %v118_v19 }
  0x23   :  { %390 = vmatpush.msrb.mxu2 %v365_v6 }
  0x25   :  { %391 = vmatpush.msrb.mxu2 %v364_v9 }
  0x27   :  { %392 = vmatpush.msrb.mxu2 %v363_v10 }
  0x29   :  { %393 = vmatpush.msrb.mxu2 %v362_v11 }
  0x86   :  { %v72_v23 = vpop.f32.mrf.mxu1 }
  0x87   :  { %v73_v25 = vadd.f32 %v784_v20, %v72_v23 }
  0x89   :  { %738 = vmatmul.msk.f32.vlgmr.msra.gmra.mxu2 %vm48_vm0, %v73_v25  ;;  %v182_v26 = vmul.f32 %v73_v25, %v73_v25 }
  0x8b   :  { %213 = vrot.lane.b32.xlu1 %v182_v26, %s798_s3 }
  0x8e   :  { %v75_v27 = vpop.f32.mrf.mxu1 }
  0x8f   :  { %v76_v28 = vadd.f32 %v784_v20, %v75_v27 }
  0x91   :  { %153 = vrot.lane.b32.xlu0 %v76_v28, %s798_s3  ;;  %739 = vmatmul.msk.f32.gmra.mxu2 %vm48_vm0, %v76_v28  ;;  %v183_v29 = vmul.f32 %v76_v28, %v76_v28 }
  0x93   :  { %215 = vrot.lane.b32.xlu1 %v183_v29, %s798_s3 }
  0x98   :  { %v111_v34 = vpop.f32.mrf.mxu1 }
  0x99   :  { %151 = vrot.lane.b32.xlu0 %v73_v25, %s798_s3  ;;  %v952_v35 = vadd.f32 %v785_v32, %v111_v34 }
  0x9b   :  { %775 = vmatpush.msrb.mxu3 %v952_v35  ;;  %774 = vmatpush.msra.mxu2 %v952_v35 }
  0xfd   :  { %v214_v30 = vpop.permute.xlu1 %213 }
  0xfe   :  { %744 = vmatmul.msk.f32.vlgmr.msra.gmra.mxu1 %vm48_vm0, %v214_v30 }
 0x103   :  { %v154_v31 = vpop.permute.xlu0 %153 }
 0x104   :  { %741 = vmatmul.msk.f32.vlgmr.msra.gmra.mxu3 %vm48_vm0, %v154_v31 }
 0x105   :  { %v216_v33 = vpop.permute.xlu1 %215 }
 0x106   :  { %745 = vmatmul.msk.f32.gmra.mxu1 %vm48_vm0, %v216_v33 }
 0x10b   :  { %v152_v36 = vpop.permute.xlu0 %151 }
 0x10c   :  { %740 = vmatmul.msk.f32.vlgmr.msra.gmra.mxu0 %vm48_vm0, %v152_v36  ;;  %v959_v37 = vpop.f32.mrf.mxu2 }
 0x10d   :  { %496 = vmatpush.msra.mxu0 %v952_v35  ;;  %v244_v46 = vsel %vm48_vm0, %v959_v37, -inf  ;;  %v251_v49 = vsel %vm250_vm2, %v959_v37, -inf  ;;  %v258_v52 = vsel %vm257_vm3, %v959_v37, -inf  ;;  %v265_v55 = vsel %vm264_vm4, %v959_v37, -inf }
 0x114   :  { %742 = vmatmul.msk.f32.vlgmr.msrb.gmra.mxu0 %vm48_vm0, %v182_v26  ;;  %v971_v43 = vpop.f32.mrf.mxu2 }
 0x115   :  { %v247_v44 = vsel %vm48_vm0, %v971_v43, -inf  ;;  %v254_v47 = vsel %vm250_vm2, %v971_v43, -inf  ;;  %v261_v50 = vsel %vm257_vm3, %v971_v43, -inf  ;;  %v268_v53 = vsel %vm264_vm4, %v971_v43, -inf }
 0x11c   :  { %743 = vmatmul.msk.f32.gmra.mxu0 %vm48_vm0, %v183_v29  ;;  %v787_v29 = vpop.eup %786 }
 0x11d   :  { %vm350_vm6 = vweird.f32 %v787_v29 }
 0x187   :  { %v961_v38 = vpop.f32.mrf.mxu3 }
 0x188   :  { %v287_v39 = vsel %vm250_vm2, %v961_v38, -inf  ;;  %v281_v45 = vsel %vm48_vm0, %v961_v38, -inf  ;;  %v293_v54 = vsel %vm257_vm3, %v961_v38, -inf  ;;  %v299_v56 = vsel %vm264_vm4, %v961_v38, -inf }
 0x189   :  { %v965_v40 = vpop.f32.mrf.mxu0  ;;  %288 = vmax.xlane.f32.xlu1 %v287_v39 }
 0x18a   :  { %v284_v41 = vsel %vm250_vm2, %v965_v40, -inf  ;;  %v278_v42 = vsel %vm48_vm0, %v965_v40, -inf  ;;  %v290_v48 = vsel %vm257_vm3, %v965_v40, -inf  ;;  %v296_v51 = vsel %vm264_vm4, %v965_v40, -inf }
 0x18b   :  { %285 = vmax.xlane.f32.xlu0 %v284_v41  ;;  %279 = vmax.xlane.f32.xlu2 %v278_v42 }
 0x191   :  { %248 = vmax.xlane.f32.xlu1 %v247_v44  ;;  %v207_v18 = vpop.f32.mrf.mxu0 }
 0x192   :  { %v320_v39 = vsub.f32 %v959_v37, %v207_v18 }
 0x193   :  { %282 = vmax.xlane.f32.xlu2 %v281_v45  ;;  %245 = vmax.xlane.f32.xlu0 %v244_v46  ;;  %v346_v45 = vmul.f32 2.0, %v787_v29 }
 0x199   :  { %255 = vmax.xlane.f32.xlu1 %v254_v47  ;;  %v210_v27 = vpop.f32.mrf.mxu0 }
 0x19a   :  { %v321_v31 = vsub.f32 %v971_v43, %v210_v27 }
 0x19b   :  { %291 = vmax.xlane.f32.xlu2 %v290_v48  ;;  %252 = vmax.xlane.f32.xlu0 %v251_v49 }
 0x1a1   :  { %262 = vmax.xlane.f32.xlu1 %v261_v50  ;;  %v347_v50 = vsub.f32 1.0, %v346_v45 }
 0x1a3   :  { %297 = vmax.xlane.f32.xlu2 %v296_v51  ;;  %259 = vmax.xlane.f32.xlu0 %v258_v52 }
 0x1a9   :  { %269 = vmax.xlane.f32.xlu1 %v268_v53 }
 0x1ab   :  { %294 = vmax.xlane.f32.xlu2 %v293_v54  ;;  %266 = vmax.xlane.f32.xlu0 %v265_v55  ;;  %v348_v54 = vmul.f32 %v787_v29, %v347_v50 }
 0x1ad   :  { %v349_v0 = vadd.f32 %v787_v29, %v348_v54 }
 0x1b3   :  { %300 = vmax.xlane.f32.xlu2 %v299_v56  ;;  %v238_v56 = vpop.f32.mrf.mxu1 }
 0x1b4   :  { %v332_v63 = vsub.f32 %v965_v40, %v238_v56 }
 0x1fc   :  { %v289_v5 = vpop.xlane.xlu1 %288 }
 0x1fe   :  { %v286_v7 = vpop.xlane.xlu0 %285  ;;  %v280_v8 = vpop.xlane.xlu2 %279 }
 0x1ff   :  { %v302_v20 = vsel %vm48_vm0, %v280_v8, %v286_v7  ;;  %v351_v7 = vsel %vm350_vm6, %v787_v29, %v349_v0 }
 0x204   :  { %v249_v12 = vpop.xlane.xlu1 %248 }
 0x206   :  { %v283_v13 = vpop.xlane.xlu2 %282  ;;  %v246_v14 = vpop.xlane.xlu0 %245 }
 0x207   :  { %v303_v53 = vsel %vm48_vm0, %v283_v13, %v289_v5 }
 0x20c   :  { %v256_v15 = vpop.xlane.xlu1 %255 }
 0x20d   :  { %v272_v30 = vsel %vm48_vm0, %v249_v12, %v256_v15  ;;  %v241_v12 = vpop.f32.mrf.mxu1 }
 0x20e   :  { %v292_v16 = vpop.xlane.xlu2 %291  ;;  %v253_v17 = vpop.xlane.xlu0 %252 }
 0x20f   :  { %v304_v22 = vsel %vm90_vm1, %v302_v20, %v292_v16  ;;  %v271_v35 = vsel %vm48_vm0, %v246_v14, %v253_v17  ;;  %v333_v14 = vsub.f32 %v961_v38, %v241_v12  ;;  %v558_v12 = vld [vmem:[%s1156_s9 + $0x60] sm:$0xff] }
 0x214   :  { %v263_v19 = vpop.xlane.xlu1 %262 }
 0x215   :  { %v274_v32 = vsel %vm90_vm1, %v272_v30, %v263_v19 }
 0x216   :  { %v298_v23 = vpop.xlane.xlu2 %297  ;;  %v260_v24 = vpop.xlane.xlu0 %259 }
 0x217   :  { %v306_v25 = vsel %vm275_vm5, %v304_v22, %v298_v23  ;;  %v273_v41 = vsel %vm90_vm1, %v271_v35, %v260_v24 }
 0x218   :  { %v308_v26 = vrot.slane %v306_v25, 4 }
 0x21a   :  { %v309_v28 = vmax.f32 %v306_v25, %v308_v26 }
 0x21c   :  { %v310_v33 = vrot.slane %v309_v28, 2  ;;  %v270_v34 = vpop.xlane.xlu1 %269 }
 0x21d   :  { %v277_v36 = vsel %vm275_vm5, %v274_v32, %v270_v34 }
 0x21e   :  { %v323_v42 = vsub.f32 %v321_v31, %v277_v36  ;;  %v295_v44 = vpop.xlane.xlu2 %294  ;;  %v267_v46 = vpop.xlane.xlu0 %266  ;;  %v311_v48 = vmax.f32 %v309_v28, %v310_v33 }
 0x21f   :  { %v276_v47 = vsel %vm275_vm5, %v273_v41, %v267_v46  ;;  %v305_v37 = vsel %vm90_vm1, %v303_v53, %v295_v44 }
 0x220   :  { %v326_v43 = vmul.f32 1.442695, %v323_v42  ;;  %v322_v49 = vsub.f32 %v320_v39, %v276_v47  ;;  %v312_v52 = vrot.slane %v311_v48, 1 }
 0x222   :  { %788 = vpow2.f32 %v326_v43  ;;  %v324_v51 = vmul.f32 1.442695, %v322_v49  ;;  %v313_v59 = vmax.f32 %v311_v48, %v312_v52 }
 0x224   :  { %790 = vpow2.f32 %v324_v51  ;;  %v334_v3 = vsub.f32 %v332_v63, %v313_v59 }
 0x226   :  { %v301_v55 = vpop.xlane.xlu2 %300  ;;  %v336_v10 = vmul.f32 1.442695, %v334_v3 }
 0x227   :  { %v307_v57 = vsel %vm275_vm5, %v305_v37, %v301_v55 }
 0x228   :  { %v789_v58 = vpop.eup %788  ;;  %v314_v60 = vrot.slane %v307_v57, 4  ;;  %792 = vpow2.f32 %v336_v10  ;;  %v559_v10 = vld [vmem:[%s1156_s9 + $0x68] sm:$0xff] }
 0x229   :  { %v329_v61 = vadd.f32 0.0001, %v789_v58 }
 0x22a   :  { %v791_v62 = vpop.eup %790  ;;  %v315_v1 = vmax.f32 %v307_v57, %v314_v60 }
 0x22b   :  { %v328_v2 = vadd.f32 0.0001, %v791_v62  ;;  %v331_v5 = vmul.f32 0.17677669, %v329_v61 }
 0x22c   :  { %v316_v4 = vrot.slane %v315_v1, 2 }
 0x22d   :  { %v330_v6 = vmul.f32 0.17677669, %v328_v2 }
 0x22e   :  { %v317_v8 = vmax.f32 %v315_v1, %v316_v4  ;;  %v793_v17 = vpop.eup %792 }
 0x22f   :  { %v344_v9 = vadd.f32 %v331_v5, %v330_v6  ;;  %v340_v18 = vadd.f32 0.0001, %v793_v17  ;;  %v561_v5 = vld [vmem:[%s1156_s9 + $0x78] sm:$0xff] }
 0x230   :  { %v318_v11 = vrot.slane %v317_v8, 1 }
 0x231   :  { %v1055_v13 = vmul.f32 %v351_v7, %v344_v9  ;;  %v342_v21 = vmul.f32 0.17677669, %v340_v18 }
 0x232   :  { %v319_v15 = vmax.f32 %v317_v8, %v318_v11 }
 0x233   :  { %625 = vrot.lane.b32.xlu1 %v1055_v13, %s798_s3 }
 0x234   :  { %v335_v40 = vsub.f32 %v333_v14, %v319_v15  ;;  %v557_v15 = vld [vmem:[%s1156_s9 + $0x58] sm:$0xff] }
 0x236   :  { %v338_v16 = vmul.f32 1.442695, %v335_v40 }
 0x238   :  { %794 = vpow2.f32 %v338_v16  ;;  %v556_v16 = vld [vmem:[%s1156_s9 + $0x50] sm:$0xff] }
 0x23e   :  { %v795_v19 = vpop.eup %794 }
 0x23f   :  { %v341_v20 = vadd.f32 0.0001, %v795_v19  ;;  %v555_v19 = vld [vmem:[%s1156_s9 + $0x48] sm:$0xff] }
 0x241   :  { %v343_v22 = vmul.f32 0.17677669, %v341_v20 }
 0x243   :  { %v353_v23 = vadd.f32 %v343_v22, %v342_v21  ;;  %v554_v21 = vld [vmem:[%s1156_s9 + $0x40] sm:$0xff] }
 0x245   :  { %v354_v24 = vmul.f32 %v353_v23, %v351_v7  ;;  %v560_v7 = vld [vmem:[%s1156_s9 + $0x70] sm:$0xff]  ;;  %v553_v23 = vld [vmem:[%s1156_s9 + $0x38] sm:$0xff] }
 0x247   :  { %400 = vxpose.xlu2.b32.start.end [1/1] (short) %v354_v24, 128  ;;  %762 = vmatpush.xpose.msk.msrb.mxu1 %vm48_vm0, %v354_v24  ;;  %v355_v38 = vrot.slane %v354_v24, 4 }
 0x248   :  { %655 = vrot.lane.b32.xlu0 %v354_v24, %s800_s8  ;;  %683 = vrot.lane.b32.xlu1 %v354_v24, %s801_s25 }
 0x249   :  { %v356_v25 = vadd.f32 %v355_v38, %v354_v24  ;;  %v552_v38 = vld [vmem:[%s1156_s9 + $0x30] sm:$0xff] }
 0x24a   :  { %763 = vmatmul.msk.f32.vlgmr.msrb.gmra.mxu1 %vm48_vm0, %v1055_v13 }
 0x24b   :  { %v357_v26 = vrot.slane %v356_v25, 2 }
 0x24d   :  { %v358_v27 = vadd.f32 %v357_v26, %v356_v25  ;;  %v551_v26 = vld [vmem:[%s1156_s9 + $0x28] sm:$0xff] }
 0x24f   :  { %v359_v28 = vrot.slane %v358_v27, 1 }
 0x250   :  { %653 = vrot.lane.b32.xlu0 %v1055_v13, %s800_s8 }
 0x251   :  { %v360_v29 = vadd.f32 %v359_v28, %v358_v27 }
 0x253   :  { %v361_v30 = vmul.f32 %v360_v29, %v1055_v13  ;;  %v550_v29 = vld [vmem:[%s1156_s9 + $0x20] sm:$0xff] }
 0x255   :  { %394 = vmatmul.f32.vlgmr.msrb.gmra.mxu2 %v361_v30 }
 0x258   :  { %681 = vrot.lane.b32.xlu0 %v1055_v13, %s801_s25 }
 0x2a5   :  { %v626_v52 = vpop.permute.xlu1 %625 }
 0x2ba   :  { %v656_v31 = vpop.permute.xlu0 %655  ;;  %v684_v37 = vpop.permute.xlu1 %683 }
 0x2bb   :  { %766 = vmatpush.xpose.msk.msrb.mxu2 %vm48_vm0, %v656_v31  ;;  %v549_v31 = vld [vmem:[%s1156_s9 + $0x18] sm:$0xff] }
 0x2c2   :  { %v654_v44 = vpop.permute.xlu0 %653 }
 0x2ca   :  { %v682_v56 = vpop.permute.xlu0 %681 }
 0x2d8   :  { %v395_v54 = vpop.f32.mrf.mxu2 }
 0x2d9   :  { %796 = vrcp.f32 %v395_v54 }
 0x2e0   :  { %v416_v32 = vpop.trf.xlu2 }
 0x2e1   :  { %746 = vmatmul.msk.f32.vlgmr.msra.gmra.mxu0 %vm432_vm7, %v416_v32 }
 0x2e8   :  { %v417_v33 = vpop.trf.xlu2 }
 0x2e9   :  { %747 = vmatmul.msk.f32.gmra.mxu0 %vm432_vm7, %v417_v33  ;;  %v548_v33 = vld [vmem:[%s1156_s9 + $0x10] sm:$0xff] }
 0x2f0   :  { %v418_v34 = vpop.trf.xlu2 }
 0x2f1   :  { %748 = vmatmul.msk.f32.gmra.mxu0 %vm432_vm7, %v418_v34 }
 0x2f8   :  { %v419_v35 = vpop.trf.xlu2 }
 0x2f9   :  { %749 = vmatmul.msk.f32.gmra.mxu0 %vm432_vm7, %v419_v35  ;;  %v547_v35 = vld [vmem:[%s1156_s9 + $0x8] sm:$0xff] }
 0x300   :  { %v420_v36 = vpop.trf.xlu2 }
 0x301   :  { %750 = vmatmul.msk.f32.gmra.mxu0 %vm432_vm7, %v420_v36 }
 0x308   :  { %v421_v39 = vpop.trf.xlu2 }
 0x309   :  { %751 = vmatmul.msk.f32.vlgmr.msra.gmra.mxu2 %vm432_vm7, %v421_v39  ;;  %v546_v39 = vld [vmem:[%s1156_s9] sm:$0xff] }
 0x310   :  { %v422_v41 = vpop.trf.xlu2 }
 0x311   :  { %752 = vmatmul.msk.f32.gmra.mxu2 %vm432_vm7, %v422_v41  ;;  %v797_v41 = vpop.eup %796 }
 0x318   :  { %v423_v42 = vpop.trf.xlu2 }
 0x319   :  { %753 = vmatmul.msk.f32.gmra.mxu2 %vm432_vm7, %v423_v42 }
 0x320   :  { %v424_v45 = vpop.trf.xlu2 }
 0x321   :  { %754 = vmatmul.msk.f32.vlgmr.msrb.gmra.mxu3 %vm432_vm7, %v424_v45  ;;  %767 = vmatmul.msk.f32.vlgmr.msrb.gmra.mxu2 %vm48_vm0, %v654_v44  ;;  %v622_v44 = vpop.f32.mrf.mxu1 }
 0x328   :  { %627 = vrot.lane.b32.xlu2 %v354_v24, %s798_s3  ;;  %v425_v46 = vpop.trf.xlu2  ;;  %s802_s3 = smov 16  }
 0x329   :  { %755 = vmatmul.msk.f32.gmra.mxu3 %vm432_vm7, %v425_v46  ;;  %v399_v46 = vmul.f32 %v797_v41, %v1055_v13 }
 0x330   :  { %v426_v47 = vpop.trf.xlu2 }
 0x331   :  { %756 = vmatmul.msk.f32.gmra.mxu3 %vm432_vm7, %v426_v47 }
 0x338   :  { %v427_v48 = vpop.trf.xlu2 }
 0x339   :  { %757 = vmatmul.msk.f32.gmra.mxu3 %vm432_vm7, %v427_v48 }
 0x340   :  { %v428_v43 = vpop.trf.xlu2 }
 0x341   :  { %758 = vmatmul.msk.f32.gmra.mxu3 %vm432_vm7, %v428_v43 }
 0x348   :  { %v429_v49 = vpop.trf.xlu2 }
 0x349   :  { %759 = vmatmul.msk.f32.gmra.mxu3 %vm432_vm7, %v429_v49 }
 0x350   :  { %v430_v50 = vpop.trf.xlu2 }
 0x351   :  { %760 = vmatmul.msk.f32.gmra.mxu3 %vm432_vm7, %v430_v50 }
 0x358   :  { %v431_v51 = vpop.trf.xlu2 }
 0x359   :  { %761 = vmatmul.msk.f32.gmra.mxu3 %vm432_vm7, %v431_v51 }
 0x35e   :  { %v498_v1 = vpop.f32.mrf.mxu0 }
 0x35f   :  { %v562_v45 = vmul.f32 %v546_v39, %v498_v1 }
 0x366   :  { %v501_v3 = vpop.f32.mrf.mxu0 }
 0x367   :  { %v563_v42 = vmul.f32 %v547_v35, %v501_v3 }
 0x36e   :  { %v504_v6 = vpop.f32.mrf.mxu0 }
 0x36f   :  { %v564_v36 = vmul.f32 %v548_v33, %v504_v6 }
 0x376   :  { %v507_v18 = vpop.f32.mrf.mxu0 }
 0x377   :  { %v565_v34 = vmul.f32 %v549_v31, %v507_v18 }
 0x37e   :  { %v510_v28 = vpop.f32.mrf.mxu0 }
 0x37f   :  { %v566_v32 = vmul.f32 %v550_v29, %v510_v28 }
 0x382   :  { %v628_v53 = vpop.permute.xlu2 %627 }
 0x383   :  { %764 = vmatpush.xpose.msk.msra.mxu1 %vm48_vm0, %v628_v53 }
 0x386   :  { %765 = vmatmul.msk.f32.vlgmr.msra.gmra.mxu1 %vm48_vm0, %v626_v52 }
 0x387   :  { %768 = vmatpush.xpose.msk.msrb.mxu1 %vm48_vm0, %v684_v37 }
 0x38c   :  { %v513_v55 = vpop.f32.mrf.mxu2 }
 0x38d   :  { %v567_v30 = vmul.f32 %v551_v26, %v513_v55 }
 0x38e   :  { %769 = vmatmul.msk.f32.vlgmr.msrb.gmra.mxu1 %vm48_vm0, %v682_v56 }
 0x394   :  { %v516_v57 = vpop.f32.mrf.mxu2 }
 0x395   :  { %v568_v27 = vmul.f32 %v552_v38, %v516_v57 }
 0x39c   :  { %v519_v58 = vpop.f32.mrf.mxu2 }
 0x39d   :  { %v569_v25 = vmul.f32 %v553_v23, %v519_v58 }
 0x3a4   :  { %v522_v59 = vpop.f32.mrf.mxu3  ;;  %v678_v60 = vpop.f32.mrf.mxu2 }
 0x3a5   :  { %714 = vrot.lane.b32.xlu0 %v678_v60, %s802_s3  ;;  %v570_v24 = vmul.f32 %v554_v21, %v522_v59 }
 0x3ac   :  { %v525_v61 = vpop.f32.mrf.mxu3 }
 0x3ad   :  { %v571_v22 = vmul.f32 %v555_v19, %v525_v61 }
 0x3b4   :  { %v528_v62 = vpop.f32.mrf.mxu3 }
 0x3b5   :  { %v572_v20 = vmul.f32 %v556_v16, %v528_v62 }
 0x3bc   :  { %v531_v63 = vpop.f32.mrf.mxu3 }
 0x3bd   :  { %v573_v17 = vmul.f32 %v557_v15, %v531_v63 }
 0x3c4   :  { %v534_v0 = vpop.f32.mrf.mxu3 }
 0x3c5   :  { %v574_v40 = vmul.f32 %v558_v12, %v534_v0 }
 0x3cc   :  { %v537_v2 = vpop.f32.mrf.mxu3 }
 0x3cd   :  { %v575_v14 = vmul.f32 %v559_v10, %v537_v2 }
 0x3d4   :  { %v540_v4 = vpop.f32.mrf.mxu3 }
 0x3d5   :  { %v576_v11 = vmul.f32 %v560_v7, %v540_v4 }
 0x3dc   :  { %v543_v8 = vpop.f32.mrf.mxu3 }
 0x3dd   :  { %v577_v9 = vmul.f32 %v561_v5, %v543_v8 }
 0x3df   :  { %578 = vmatpush.msrb.mxu0 %v577_v9 }
 0x3e1   :  { %579 = vmatpush.msrb.mxu0 %v576_v11 }
 0x3e3   :  { %580 = vmatpush.msrb.mxu0 %v575_v14 }
 0x3e5   :  { %581 = vmatpush.msrb.mxu0 %v574_v40 }
 0x3e7   :  { %582 = vmatpush.msrb.mxu0 %v573_v17 }
 0x3e9   :  { %583 = vmatpush.msrb.mxu0 %v572_v20 }
 0x3eb   :  { %584 = vmatpush.msrb.mxu0 %v571_v22 }
 0x3ed   :  { %585 = vmatpush.msrb.mxu0 %v570_v24 }
 0x3ef   :  { %586 = vmatpush.msrb.mxu0 %v569_v25 }
 0x3f1   :  { %587 = vmatpush.msrb.mxu0 %v568_v27 }
 0x3f3   :  { %588 = vmatpush.msrb.mxu0 %v567_v30 }
 0x3f5   :  { %589 = vmatpush.msrb.mxu0 %v566_v32 }
 0x3f7   :  { %590 = vmatpush.msrb.mxu0 %v565_v34 }
 0x3f9   :  { %591 = vmatpush.msrb.mxu0 %v564_v36 }
 0x3fb   :  { %592 = vmatpush.msrb.mxu0 %v563_v42 }
 0x3fd   :  { %593 = vmatpush.msrb.mxu0 %v562_v45 }
 0x3fe   :  { %594 = vmatmul.f32.vlgmr.msrb.gmra.mxu0 %v399_v46 }
 0x403   :  { %v650_v47 = vpop.f32.mrf.mxu1 }
 0x404   :  { %710 = vrot.lane.b32.xlu1 %v650_v47, %s803_s30 }
 0x40b   :  { %v706_v48 = vpop.f32.mrf.mxu1 }
 0x40c   :  { %718 = vrot.lane.b32.xlu1 %v706_v48, %s804_s12 }
 0x417   :  { %v715_v13 = vpop.permute.xlu0 %714 }
 0x476   :  { %v711_v43 = vpop.permute.xlu1 %710 }
 0x477   :  { %v721_v49 = vsel %vm432_vm7, %v622_v44, %v711_v43 }
 0x478   :  { %v723_v52 = vsel %vm722_vm8, %v721_v49, %v715_v13 }
 0x47b   :  { %v595_v50 = vpop.f32.mrf.mxu0 }
 0x47c   :  { %598 = vst.msk [vmem:[%s1157_s10] sm:$0xff] %vm90_vm1, %v595_v50 }
 0x47e   :  { %v719_v51 = vpop.permute.xlu1 %718 }
 0x47f   :  { %v725_v53 = vsel %vm724_vm9, %v723_v52, %v719_v51 }
 0x480   :  { %726 = vst.msk [vmem:[%s1158_s11] sm:$0xff] %vm48_vm0, %v725_v53 }

</bundles_post_ra>
